<compile_context>
chip_gen: v7x
topology: tpu7x:2x2x1
jax: 0.10.0
libtpu: 0.0.40
codegen_flags: <defaults>
</compile_context>

<pallas_src>
import math

import jax
import jax.numpy as jnp
from jax.experimental import pallas as pl
from jax.experimental.pallas import tpu as pltpu


_GELU_C1 = math.sqrt(2.0 / math.pi)
_GELU_C2 = 0.044715 * math.sqrt(2.0 / math.pi)


def _gelu_tanh_folded(x):
    # 0.5*x*(1 + tanh(sqrt(2/pi)*(x + 0.044715*x^3)))
    #   == h + h*t   with   h = 0.5*x,  t = tanh(x*(c1 + c2*x*x))
    t = jnp.tanh(x * (_GELU_C1 + _GELU_C2 * (x * x)))
    h = 0.5 * x
    return h + h * t


def _round_up(x, m):
    return (x + m - 1) // m * m


def bert_intermediate_kernel(x_ref, w_ref, b_ref, o_ref):
    # x_ref: (tm, H) input dtype; w_ref: (H, tn) bf16; b_ref: (1, tn) f32;
    # o_ref: (tm, tn) out dtype.
    x = x_ref[...].astype(jnp.bfloat16)            # in-kernel cast, hidden under MXU
    acc = jnp.dot(x, w_ref[...], preferred_element_type=jnp.float32)
    acc = acc + b_ref[...]                         # bias broadcast over rows, f32
    o_ref[...] = _gelu_tanh_folded(acc).astype(o_ref.dtype)


def _pick_tiles(M, H, I, x_bytes, o_bytes, budget_bytes):
    """Largest (tm, tn) whose double-buffered footprint fits the VMEM budget.

    Prefers tn == I (whole bf16 weight panel VMEM-resident -> streamed from
    HBM exactly once); falls back to 128-aligned I tiles for huge weights.
    """
    tm_cap = _round_up(M, 8)

    def footprint(tm, tn):
        return 2 * (tm * H * x_bytes          # activation tile (double-buffered)
                    + H * tn * 2              # bf16 weight panel
                    + tm * tn * o_bytes       # output tile
                    + 8 * tn * 4)             # bias tile (sublane-padded)

    tn_candidates = [I] + [t for t in (1024, 512, 256, 128) if t < I]
    for tn in tn_candidates:
        for tm in (1024, 512, 256, 128, 64, 32, 16, 8):
            tm = min(tm, tm_cap)
            if footprint(tm, tn) <= budget_bytes:
                return tm, tn
    return min(8, tm_cap), min(_round_up(I, 128), 128)


def bert_intermediate(hidden_states, weight_t, bias, *,
                      out_dtype=jnp.bfloat16,
                      vmem_budget_bytes=24 * 1024 * 1024):
    """hidden_states: [B, S, H]; weight_t: [H, I]; bias: [I] -> [B, S, I]."""
    B, S, H = hidden_states.shape
    Hw, I = weight_t.shape
    assert Hw == H

    M = B * S
    x2d = hidden_states.reshape(M, H)              # no dtype copy: cast is in-kernel
    w2d = weight_t.astype(jnp.bfloat16)            # weight cast once (cheap, reused)
    b2d = bias.astype(jnp.float32).reshape(1, I)

    x_bytes = x2d.dtype.itemsize
    o_bytes = jnp.dtype(out_dtype).itemsize
    tm, tn = _pick_tiles(M, H, I, x_bytes, o_bytes, vmem_budget_bytes)

    n_i = pl.cdiv(M, tm)
    n_j = pl.cdiv(I, tn)
    grid = (n_i, n_j)

    # Weight block index is constant across the whole grid when n_j == 1, so
    # Pallas fetches the panel exactly once; otherwise it restreams per M-tile.
    w_streams = 1 if n_j == 1 else n_i
    cost = pl.CostEstimate(
        flops=2 * M * H * I,
        transcendentals=M * I,
        bytes_accessed=(M * H * x_bytes + w_streams * H * I * 2
                        + M * I * o_bytes + I * 4),
    )

    footprint = 2 * (tm * H * x_bytes + H * tn * 2 + tm * tn * o_bytes + 8 * tn * 4)
    vmem_limit = max(32 * 1024 * 1024, footprint + 4 * 1024 * 1024)

    # TODO(synk): for H large enough that a full-H block itself blows VMEM
    # (not a BERT config), add a K grid axis with an f32 VMEM accumulator.
    out2d = pl.pallas_call(
        bert_intermediate_kernel,
        out_shape=jax.ShapeDtypeStruct((M, I), out_dtype),
        grid_spec=pltpu.PrefetchScalarGridSpec(
            num_scalar_prefetch=0,
            grid=grid,
            in_specs=[
                pl.BlockSpec((tm, H), lambda i, j: (i, 0)),   # activation rows
                pl.BlockSpec((H, tn), lambda i, j: (0, j)),   # weight panel
                pl.BlockSpec((1, tn), lambda i, j: (0, j)),   # bias
            ],
            out_specs=pl.BlockSpec((tm, tn), lambda i, j: (i, j)),
        ),
        compiler_params=pltpu.CompilerParams(
            # M axis first so v7x megacore shards row tiles across the 2 TCs.
            dimension_semantics=("parallel", "parallel"),
            vmem_limit_bytes=vmem_limit,
        ),
        cost_estimate=cost,
    )(x2d, w2d, b2d)

    return out2d.reshape(B, S, I)


if __name__ == "__main__":
    # Small BERT-ish config: hidden=32, intermediate=128, batch=2, seq=8.
    B, S, H, I = 2, 8, 32, 128

    key = jax.random.PRNGKey(0)
    kx, kw, kb = jax.random.split(key, 3)

    hidden_states = jax.random.normal(kx, (B, S, H), dtype=jnp.float32)
    # nn.Linear weight is [I, H]; the kernel takes its transpose [H, I].
    weight = jax.random.normal(kw, (I, H), dtype=jnp.float32) * 0.02
    bias = jax.random.normal(kb, (I,), dtype=jnp.float32) * 0.02
    weight_t = weight.T

    out = bert_intermediate(hidden_states, weight_t, bias)
    out = jax.block_until_ready(out)

    # Pure-JAX reference with the same bf16-cast matmul inputs (f32 math).
    xr = hidden_states.astype(jnp.bfloat16).astype(jnp.float32).reshape(B * S, H)
    wr = weight_t.astype(jnp.bfloat16).astype(jnp.float32)
    pre = xr @ wr + bias
    ref = 0.5 * pre * (1.0 + jnp.tanh(math.sqrt(2.0 / math.pi)
                                      * (pre + 0.044715 * pre ** 3)))
    ref = ref.reshape(B, S, I)

    assert out.shape == (B, S, I)
    err = float(jnp.max(jnp.abs(out.astype(jnp.float32) - ref)))
    assert err < 1e-2, err   # bf16 output rounding dominates the error

    print("KERNEL_OK")
</pallas_src>

<mosaic_0001>
module attributes {stable_mosaic.version = 11 : i64} {
  func.func @bert_intermediate_kernel(%arg0: i32, %arg1: i32, %arg2: memref<16x32xf32, #tpu.memory_space<vmem>>, %arg3: memref<32x128xbf16, #tpu.memory_space<vmem>>, %arg4: memref<1x128xf32, #tpu.memory_space<vmem>>, %arg5: memref<16x128xbf16, #tpu.memory_space<vmem>>) attributes {dimension_semantics = [#tpu.dimension_semantics<parallel>, #tpu.dimension_semantics<parallel>], iteration_bounds = array<i64: 1, 1>, scalar_prefetch = 0 : i64, scratch_operands = 0 : i64, tpu.core_type = #tpu.core_type<tc>, window_params = [{transform_indices = @transform_0, window_bounds = array<i64: 16, 32>}, {transform_indices = @transform_1, window_bounds = array<i64: 32, 128>}, {transform_indices = @transform_2, window_bounds = array<i64: 1, 128>}, {transform_indices = @transform_3, window_bounds = array<i64: 16, 128>}]} {
    %c0 = arith.constant 0 : index
    %c0_0 = arith.constant 0 : index
    %0 = vector.load %arg2[%c0, %c0_0] : memref<16x32xf32, #tpu.memory_space<vmem>>, vector<16x32xf32>
    %1 = arith.truncf %0 : vector<16x32xf32> to vector<16x32xbf16>
    %c0_1 = arith.constant 0 : index
    %c0_2 = arith.constant 0 : index
    %2 = vector.load %arg3[%c0_1, %c0_2] : memref<32x128xbf16, #tpu.memory_space<vmem>>, vector<32x128xbf16>
    %cst = arith.constant dense<0.000000e+00> : vector<16x128xf32>
    %3 = tpu.matmul %1, %2, %cst {dimension_numbers = #tpu.dot_dimension_numbers<[1], [0], [0], [1], [0, 0, 1, 1], [], []>} : vector<16x32xbf16>, vector<32x128xbf16>, vector<16x128xf32> -> vector<16x128xf32>
    %c0_3 = arith.constant 0 : index
    %c0_4 = arith.constant 0 : index
    %4 = vector.load %arg4[%c0_3, %c0_4] : memref<1x128xf32, #tpu.memory_space<vmem>>, vector<1x128xf32>
    %5 = vector.broadcast %4 : vector<1x128xf32> to vector<16x128xf32>
    %6 = arith.addf %3, %5 : vector<16x128xf32>
    %7 = arith.mulf %6, %6 : vector<16x128xf32>
    %cst_5 = arith.constant 0.0356774069 : f32
    %8 = vector.broadcast %cst_5 : f32 to vector<16x128xf32>
    %9 = arith.mulf %8, %7 : vector<16x128xf32>
    %cst_6 = arith.constant 0.797884583 : f32
    %10 = vector.broadcast %cst_6 : f32 to vector<16x128xf32>
    %11 = arith.addf %10, %9 : vector<16x128xf32>
    %12 = arith.mulf %6, %11 : vector<16x128xf32>
    %13 = math.tanh %12 : vector<16x128xf32>
    %cst_7 = arith.constant 5.000000e-01 : f32
    %14 = vector.broadcast %cst_7 : f32 to vector<16x128xf32>
    %15 = arith.mulf %14, %6 : vector<16x128xf32>
    %16 = arith.mulf %15, %13 : vector<16x128xf32>
    %17 = arith.addf %15, %16 : vector<16x128xf32>
    %18 = arith.truncf %17 : vector<16x128xf32> to vector<16x128xbf16>
    %c0_8 = arith.constant 0 : index
    %c0_9 = arith.constant 0 : index
    %19 = vector.load %arg5[%c0_8, %c0_9] : memref<16x128xbf16, #tpu.memory_space<vmem>>, vector<16x128xbf16>
    tpu.vector_store %arg5[%c0_8, %c0_9], %18 {strides = array<i32>} : memref<16x128xbf16, #tpu.memory_space<vmem>>, vector<16x128xbf16>,
    return
  }
  func.func @transform_0(%arg0: i32, %arg1: i32) -> (i32, i32) {
    %c0_i32 = arith.constant 0 : i32
    %c0_i32_0 = arith.constant 0 : i32
    return %arg0, %c0_i32 : i32, i32
  }
  func.func @transform_1(%arg0: i32, %arg1: i32) -> (i32, i32) {
    %c0_i32 = arith.constant 0 : i32
    %c0_i32_0 = arith.constant 0 : i32
    return %c0_i32, %arg1 : i32, i32
  }
  func.func @transform_2(%arg0: i32, %arg1: i32) -> (i32, i32) {
    %c0_i32 = arith.constant 0 : i32
    %c0_i32_0 = arith.constant 0 : i32
    return %c0_i32, %arg1 : i32, i32
  }
  func.func @transform_3(%arg0: i32, %arg1: i32) -> (i32, i32) {
    %c0_i32 = arith.constant 0 : i32
    return %arg0, %arg1 : i32, i32
  }
}

</mosaic_0001>

<bundles_post_ra>
// kernel: tpu_custom_call.1
= control target key start
LH: loop header
LB: loop body
LE: loop exit
PB: predicated region body
PF: predicated region fallthrough
CT: control target
= control target key end

     0   :  { %8 = vsyncpa [#allocation3], 0  ;;  %s344_s0 = inlined_call_operand.hbm [shape: f32[16,32], index: 0, kind: input, shape index: {}]   ;;  %s345_s1 = inlined_call_operand.hbm [shape: bf16[32,128], index: 1, kind: input, shape index: {}]   ;;  %s346_s2 = inlined_call_operand.vmem [shape: f32[1,128], index: 2, kind: input, shape index: {}]   ;;  %s347_s3 = inlined_call_operand.hbm [shape: bf16[16,128], index: 3, kind: output, shape index: {}]  }
   0x1   :  { %9 = vsyncpa [#allocation6], 0 }
   0x2   :  { %10 = vsyncpa [#allocation4], 0  ;;  %s270_s12 = smov [#allocation2]   ;;  %s198_s16 = scalar_lea.hbm %s344_s0, 256 }
   0x3   :  { %s16_s13 = sshll.u32 %s270_s12, 4  ;;  %p199_p0 = scmp.ne.s32.totalorder %s344_s0, %s198_s16  ;;  %s17_s13 = int_to_ptr.vmem [resolvable:$true] %s16_s13 }
   0x4   :  { %p202_p1 = scmp.lt.u32.totalorder %s198_s16, %s344_s0 }
   0x6   :  { %p204_p2 = pnand %p202_p1, %p199_p0 }
   0x8   :  { %207 = shalt.err (!%p204_p2)
}
   0x9   :  { %s208_s21 = scalar_lea.vmem %s17_s13, 256  ;;  %p213_p4 = scmp.lt.s32.totalorder %s17_s13, %s17_s13 }
   0xa   :  { %p209_p3 = scmp.ne.s32.totalorder %s17_s13, %s208_s21  ;;  %p214_p5 = scmp.lt.s32.totalorder %s208_s21, %s208_s21 }
   0xc   :  { %p215_p6 = por %p214_p5, %p213_p4 }
   0xe   :  { %p216_p7 = pnand %p215_p6, %p209_p3 }
  0x10   :  { %219 = shalt.err (!%p216_p7)
}
  0x11   :  { %s271_s22 = smov 128   ;;  %s272_s23 = smov 8  }
  0x12   :  { %22 = dma.hbm_to_vmem [thread:$0]  %s344_s0, 256, %s17_s13, [#allocation3], %s271_s22, %s271_s22, %s272_s23  }
  0x13   :  { %s273_s26 = smov [#allocation5]   ;;  %s220_s30 = scalar_lea.hbm %s345_s1, 256 }
  0x14   :  { %s28_s27 = sshll.u32 %s273_s26, 4  ;;  %p221_p8 = scmp.ne.s32.totalorder %s345_s1, %s220_s30  ;;  %s29_s27 = int_to_ptr.vmem [resolvable:$true] %s28_s27 }
  0x15   :  { %p224_p9 = scmp.lt.u32.totalorder %s220_s30, %s345_s1 }
  0x17   :  { %p226_p10 = pnand %p224_p9, %p221_p8 }
  0x19   :  { %229 = shalt.err (!%p226_p10)
}
  0x1a   :  { %s230_s8 = scalar_lea.vmem %s29_s27, 256  ;;  %p235_p12 = scmp.lt.s32.totalorder %s29_s27, %s29_s27 }
  0x1b   :  { %p231_p11 = scmp.ne.s32.totalorder %s29_s27, %s230_s8  ;;  %p236_p13 = scmp.lt.s32.totalorder %s230_s8, %s230_s8 }
  0x1d   :  { %p237_p0 = por %p236_p13, %p235_p12 }
  0x1f   :  { %p238_p1 = pnand %p237_p0, %p231_p11 }
  0x21   :  { %241 = shalt.err (!%p238_p1)
}
  0x22   :  { %s274_s0 = smov 64   ;;  %s275_s9 = smov 4  }
  0x23   :  { %34 = dma.hbm_to_vmem [thread:$0]  %s345_s1, 256, %s29_s27, [#allocation6], %s274_s0, %s274_s0, %s275_s9  }
  0x24   :  { %264 = dma.done.wait [#allocation3], 256  }
  0x25   :  { %265 = vsyncadd [#allocation3], 4294967040 }
  0x26   :  { %266 = dma.done.wait [#allocation6], 256  }
  0x27   :  { %267 = vsyncadd [#allocation6], 4294967040  ;;  %v276_v0 = vmov 0.0   ;;  %vm277_vm0 = vmmov 0   ;;  %v192_v1 = vld [vmem:[#allocation5] sm:$0xff]   ;;  %v193_v2 = vld [vmem:[#allocation5 + $0x8] sm:$0xff]  }
  0x28   :  { %175 = vmatprep.subr.bf16.mxu0 %v276_v0  ;;  %179 = vmatprep.mubr.msk.bf16.mxu0 %vm277_vm0, %v276_v0  ;;  %v44_v3 = vld [vmem:[#allocation2] sm:$0xff]  ;;  %v45_v4 = vld [vmem:[#allocation2 + $0x8] sm:$0xff]  ;;  %vm70_vm1 = vcmask 261120  }
  0x29   :  { %176 = vmatpush3.bf16.msra.mxu0 %v192_v1  ;;  %v46_v5 = vpack.c.bf16 %v45_v4, %v44_v3  ;;  %v159_v6 = vld [vmem:[%s346_s2] ss:$0 sm:$0xff]  ;;  %s278_s2 = smov [#allocation7]  }
  0x2a   :  { %177 = vmatprep.subr.bf16.mxu0 %v276_v0  ;;  %s146_s13 = sshll.u32 %s278_s2, 4  ;;  %s147_s13 = int_to_ptr.vmem [resolvable:$true] %s146_s13 }
  0x2b   :  { %s242_s14 = scalar_lea.vmem %s147_s13, 128  ;;  %p247_p3 = scmp.lt.s32.totalorder %s147_s13, %s147_s13 }
  0x2c   :  { %p243_p2 = scmp.ne.s32.totalorder %s147_s13, %s242_s14  ;;  %p248_p4 = scmp.lt.s32.totalorder %s242_s14, %s242_s14 }
  0x2d   :  { %178 = vmatpush3.bf16.msra.mxu0 %v193_v2 }
  0x2e   :  { %p249_p5 = por %p248_p4, %p247_p3 }
  0x30   :  { %180 = vmatmul.mubr.msk.bf16.vlgmr.msra.gmra.mrb[0].mxu0 %vm70_vm1, %v46_v5  ;;  %p250_p6 = pnand %p249_p5, %p243_p2 }
 0x103   :  { %v108_v7 = vpop.f32.mrb[0].mxu0 }
 0x104   :  { %v109_v8 = vadd.f32 %v159_v6, %v108_v7  ;;  %v181_v9 = vpop.f32.mrb[1].mxu0 }
 0x105   :  { %v111_v10 = vpop.f32.mrb[2].mxu0 }
 0x106   :  { %v115_v11 = vmul.f32 %v109_v8, %v109_v8  ;;  %v112_v12 = vadd.f32 %v159_v6, %v111_v10  ;;  %v182_v13 = vpop.f32.mrb[3].mxu0  ;;  %v125_v21 = vmul.f32 0.5, %v109_v8 }
 0x108   :  { %v117_v14 = vmul.f32 0.035677407, %v115_v11  ;;  %v116_v15 = vmul.f32 %v112_v12, %v112_v12  ;;  %v126_v24 = vmul.f32 0.5, %v112_v12 }
 0x10a   :  { %v119_v16 = vadd.f32 0.7978846, %v117_v14  ;;  %v118_v17 = vmul.f32 0.035677407, %v116_v15 }
 0x10c   :  { %v121_v18 = vmul.f32 %v119_v16, %v109_v8  ;;  %v120_v19 = vadd.f32 0.7978846, %v118_v17 }
 0x10e   :  { %194 = vtanh.f32 %v121_v18  ;;  %v122_v20 = vmul.f32 %v120_v19, %v112_v12 }
 0x110   :  { %196 = vtanh.f32 %v122_v20 }
 0x118   :  { %v195_v22 = vpop.eup %194 }
 0x119   :  { %v127_v23 = vmul.f32 %v195_v22, %v125_v21 }
 0x11a   :  { %v197_v25 = vpop.eup %196 }
 0x11b   :  { %v128_v26 = vmul.f32 %v197_v25, %v126_v24  ;;  %v129_v27 = vadd.f32 %v127_v23, %v125_v21 }
 0x11d   :  { %v130_v28 = vadd.f32 %v128_v26, %v126_v24 }
 0x11f   :  { %v170_v29 = vpack.c.bf16 %v130_v28, %v129_v27 }
 0x121   :  { %171 = vst [vmem:[#allocation7] sm:$0xff] %v170_v29  }
 0x122   :  { %253 = shalt.err (!%p250_p6)
}
 0x123   :  { %s254_s17 = scalar_lea.hbm %s347_s3, 128 }
 0x124   :  { %p255_p7 = scmp.ne.s32.totalorder %s347_s3, %s254_s17  ;;  %p258_p8 = scmp.lt.u32.totalorder %s254_s17, %s347_s3 }
 0x126   :  { %p260_p9 = pnand %p258_p8, %p255_p7 }
 0x128   :  { %263 = shalt.err (!%p260_p9)
}
 0x129   :  { %152 = dma.vmem_to_hbm [thread:$0]  %s147_s13, 128, %s347_s3, [#allocation4], %s274_s0, %s274_s0, %s275_s9  }
 0x12a   :  { %268 = dma.done.wait [#allocation4], 128  }
 0x12b   :  { %269 = vsyncadd [#allocation4], 4294967168 }
 0x12c   :  { %156 = vsyncpa [#allocation3], 1 }
 0x12d   :  { %157 = vsyncpa [#allocation6], 1 }
 0x12e   :  { %158 = vsyncpa [#allocation4], 1 }

</bundles_post_ra>
